<compile_context>
chip_gen: v6e
topology: v6e:2x2x1
jax: 0.10.0
libtpu: 0.0.40
codegen_flags: <defaults>
</compile_context>

<pallas_src>
import functools

import jax
import jax.numpy as jnp
from jax.experimental import pallas as pl
from jax.experimental.pallas import tpu as pltpu


def _round_up(v, m):
    return ((v + m - 1) // m) * m


def _vmem_capacity_bytes():
    """Physical per-TensorCore VMEM; falls back to the smallest (v7x, 64 MiB)."""
    try:
        info = pltpu.get_tpu_info()
        cap = getattr(info, "vmem_capacity_bytes", None)
        if cap:
            return int(cap)
    except Exception:
        pass
    return 64 * 1024 * 1024


def _ce_partial_kernel(logits_ref, target_ref, out_ref, *, n_rows, tb):
    """Per-block partial sum of per-row NLL for one (tb, C) logits tile."""
    i = pl.program_id(0)
    x = logits_ref[...]                                   # (tb, C) input dtype
    tgt = target_ref[...]                                 # (tb, 1) int32

    # Row max / shift in the input dtype (full-rate bf16 VALU on v6e/v7x);
    # cast to f32 only for exp / accumulation.
    m = jnp.max(x, axis=-1, keepdims=True)                # (tb, 1)
    shifted = (x - m).astype(jnp.float32)                 # (tb, C), all <= 0

    # In-kernel gather of the (shifted) target logit via iota compare.
    col = jax.lax.broadcasted_iota(jnp.int32, shifted.shape, 1)
    tgt_shift = jnp.sum(jnp.where(col == tgt, shifted, 0.0),
                        axis=-1, keepdims=True)           # (tb, 1)

    lse_shift = jnp.log(jnp.sum(jnp.exp(shifted), axis=-1, keepdims=True))
    nll = lse_shift - tgt_shift                           # (tb, 1) f32

    # Ragged last block: rows beyond the true batch contain garbage and must
    # contribute exactly zero.
    row = i * tb + jax.lax.broadcasted_iota(jnp.int32, nll.shape, 0)
    nll = jnp.where(row < n_rows, nll, 0.0)

    # Lane-dense (1, 8, 128) output tile carrying this block's partial sum.
    out_ref[...] = jnp.broadcast_to(jnp.sum(nll), out_ref.shape)


def cross_entropy_mean(logits, target):
    """Mean cross-entropy of (N, C) float logits against (N,) int targets."""
    n, c = logits.shape
    itemsize = jnp.dtype(logits.dtype).itemsize
    # Sublane packing: 8 rows for 32-bit, 16 for bf16/fp16, 32 for 8-bit.
    align = max(8, 32 // itemsize)

    # Per-generation budgets.  A block is amplified ~3-4x in VMEM (2 pipeline
    # buffers in the input dtype + the f32 working copy / intermediates), so
    # the raw block cap stays well below vmem_limit_bytes.
    vmem_cap = _vmem_capacity_bytes()
    if vmem_cap >= 96 * 1024 * 1024:            # v5e / v6e: 128 MiB per TC
        block_cap = 12 * 1024 * 1024
        vmem_limit = 96 * 1024 * 1024
    else:                                       # v7x: 64 MiB per TC
        block_cap = 6 * 1024 * 1024
        vmem_limit = 44 * 1024 * 1024

    row_bytes = max(c * itemsize, 1)
    tb = max(align, (block_cap // row_bytes) // align * align)
    # Grid occupancy: aim for >= 8 blocks so the "parallel" batch axis shards
    # across both TensorCores on v7x; per-step overhead stays negligible on
    # single-TC chips.
    tb = min(tb, _round_up(max(-(-n // 8), 1), align))
    tb = min(tb, _round_up(n, align))
    num_blocks = -(-n // tb)

    # TODO(synk): for huge class counts (align * C * itemsize > block_cap) add
    # a second 'arbitrary' grid axis over C with an online (flash-style)
    # running-max / logsumexp / target-logit accumulator in VMEM scratch so
    # the footprint stays flat for any C.

    t = target.astype(jnp.int32).reshape(n, 1)

    kernel = functools.partial(_ce_partial_kernel, n_rows=n, tb=tb)
    partials = pl.pallas_call(
        kernel,
        out_shape=jax.ShapeDtypeStruct((num_blocks, 8, 128), jnp.float32),
        grid=(num_blocks,),
        in_specs=[
            pl.BlockSpec((tb, c), lambda i: (i, 0)),   # true C as last block dim
            pl.BlockSpec((tb, 1), lambda i: (i, 0)),
        ],
        out_specs=pl.BlockSpec((1, 8, 128), lambda i: (i, 0, 0)),
        compiler_params=pltpu.CompilerParams(
            dimension_semantics=("parallel",),
            vmem_limit_bytes=vmem_limit,
        ),
        cost_estimate=pl.CostEstimate(
            flops=5 * n * c,
            transcendentals=n * c,
            bytes_accessed=n * c * itemsize + n * 4 + num_blocks * 8 * 128 * 4,
        ),
    )(logits, t)

    # Tiny reduction + mean in the wrapper; padded/garbage rows contributed 0.
    # TODO(synk): PyTorch-style ignore_index would also shrink the divisor.
    return jnp.sum(partials[:, 0, 0]) / jnp.float32(n)


class PallasCrossEntropyLoss:
    """Concrete Pallas-backed realization of the AbstractLoss interface."""

    def forward(self, input, target, idx=None):
        # `idx` is part of the abstract signature; it does not affect the loss.
        return cross_entropy_mean(input, target)

    def __call__(self, input, target, idx=None):
        return self.forward(input, target, idx)

    # TODO(synk): abstract callbacks carry no computation; kept as no-ops.
    def batch_closure_callback(self, batch_state):
        return batch_state

    def epoch_closure_callback(self, epoch_state):
        return epoch_state


def _reference_ce(logits, target):
    lse = jax.nn.logsumexp(logits.astype(jnp.float32), axis=-1)
    tgt = jnp.take_along_axis(logits.astype(jnp.float32),
                              target[:, None].astype(jnp.int32), axis=-1)[:, 0]
    return jnp.mean(lse - tgt)


if __name__ == "__main__":
    key = jax.random.PRNGKey(0)
    loss_fn = PallasCrossEntropyLoss()

    # Case 1: small aligned shapes.
    k1, k2, key = jax.random.split(key, 3)
    batch, num_classes = 8, 32
    logits = jax.random.normal(k1, (batch, num_classes), dtype=jnp.float32)
    target = jax.random.randint(k2, (batch,), 0, num_classes, dtype=jnp.int32)
    idx = jnp.arange(batch, dtype=jnp.int32)  # unused, interface parity
    loss = loss_fn(logits, target, idx)
    jax.block_until_ready(loss)
    ref = _reference_ce(logits, target)
    assert jnp.allclose(loss, ref, atol=1e-5, rtol=1e-5), (loss, ref)

    # Case 2: non-multiple batch / class counts (exercises ragged-block and
    # non-128 lane handling without any wrapper-side padding).
    k3, k4, key = jax.random.split(key, 3)
    batch2, num_classes2 = 10, 40
    logits2 = jax.random.normal(k3, (batch2, num_classes2), dtype=jnp.float32)
    target2 = jax.random.randint(k4, (batch2,), 0, num_classes2, dtype=jnp.int32)
    loss2 = loss_fn(logits2, target2, jnp.arange(batch2, dtype=jnp.int32))
    jax.block_until_ready(loss2)
    ref2 = _reference_ce(logits2, target2)
    assert jnp.allclose(loss2, ref2, atol=1e-5, rtol=1e-5), (loss2, ref2)

    print("KERNEL_OK")
</pallas_src>

<mosaic_0001>
module attributes {stable_mosaic.version = 11 : i64} {
  func.func @_ce_partial_kernel(%arg0: i32, %arg1: memref<8x32xf32, #tpu.memory_space<vmem>>, %arg2: memref<8x1xi32, #tpu.memory_space<vmem>>, %arg3: memref<1x8x128xf32, #tpu.memory_space<vmem>>) attributes {dimension_semantics = [#tpu.dimension_semantics<parallel>], iteration_bounds = array<i64: 1>, scalar_prefetch = 0 : i64, scratch_operands = 0 : i64, tpu.core_type = #tpu.core_type<tc>, window_params = [{transform_indices = @transform_0, window_bounds = array<i64: 8, 32>}, {transform_indices = @transform_1, window_bounds = array<i64: 8, 1>}, {transform_indices = @transform_2, window_bounds = array<i64: 1, 8, 128>}]} {
    %c0 = arith.constant 0 : index
    %c0_0 = arith.constant 0 : index
    %0 = vector.load %arg1[%c0, %c0_0] : memref<8x32xf32, #tpu.memory_space<vmem>>, vector<8x32xf32>
    %c0_1 = arith.constant 0 : index
    %c0_2 = arith.constant 0 : index
    %1 = vector.load %arg2[%c0_1, %c0_2] : memref<8x1xi32, #tpu.memory_space<vmem>>, vector<8x1xi32>
    %cst = arith.constant dense<0xFF800000> : vector<8xf32>
    %2 = vector.multi_reduction <maximumf>, %0, %cst [1] : vector<8x32xf32> to vector<8xf32>
    %3 = vector.shape_cast %2 : vector<8xf32> to vector<8x1xf32>
    %4 = vector.broadcast %3 : vector<8x1xf32> to vector<8x32xf32>
    %5 = arith.subf %0, %4 : vector<8x32xf32>
    %6 = tpu.iota {dimensions = array<i32: 1>} : vector<8x32xi32>
    %7 = vector.broadcast %1 : vector<8x1xi32> to vector<8x32xi32>
    %8 = arith.cmpi eq, %6, %7 : vector<8x32xi32>
    %cst_3 = arith.constant 0.000000e+00 : f32
    %9 = vector.broadcast %cst_3 : f32 to vector<8x32xf32>
    %10 = arith.select %8, %5, %9 : vector<8x32xi1>, vector<8x32xf32>
    %cst_4 = arith.constant dense<0.000000e+00> : vector<8xf32>
    %11 = vector.multi_reduction <add>, %10, %cst_4 [1] : vector<8x32xf32> to vector<8xf32>
    %12 = vector.shape_cast %11 : vector<8xf32> to vector<8x1xf32>
    %13 = math.exp %5 : vector<8x32xf32>
    %cst_5 = arith.constant dense<0.000000e+00> : vector<8xf32>
    %14 = vector.multi_reduction <add>, %13, %cst_5 [1] : vector<8x32xf32> to vector<8xf32>
    %15 = vector.shape_cast %14 : vector<8xf32> to vector<8x1xf32>
    %16 = math.log %15 : vector<8x1xf32>
    %17 = arith.subf %16, %12 : vector<8x1xf32>
    %c8_i32 = arith.constant 8 : i32
    %18 = arith.muli %arg0, %c8_i32 : i32
    %19 = tpu.iota {dimensions = array<i32: 0>} : vector<8x1xi32>
    %20 = vector.broadcast %18 : i32 to vector<8x1xi32>
    %21 = arith.addi %20, %19 : vector<8x1xi32>
    %c8_i32_6 = arith.constant 8 : i32
    %22 = vector.broadcast %c8_i32_6 : i32 to vector<8x1xi32>
    %23 = arith.cmpi slt, %21, %22 : vector<8x1xi32>
    %cst_7 = arith.constant 0.000000e+00 : f32
    %24 = vector.broadcast %cst_7 : f32 to vector<8x1xf32>
    %25 = arith.select %23, %17, %24 : vector<8x1xi1>, vector<8x1xf32>
    %26 = vector.shape_cast %25 : vector<8x1xf32> to vector<1x8x1xf32>
    %cst_8 = arith.constant dense<0.000000e+00> : vector<1xf32>
    %27 = vector.multi_reduction <add>, %26, %cst_8 [1, 2] : vector<1x8x1xf32> to vector<1xf32>
    %28 = vector.shape_cast %27 : vector<1xf32> to vector<1x1x1xf32>
    %29 = vector.extract %28[0, 0, 0] : f32 from vector<1x1x1xf32>
    %30 = vector.broadcast %29 : f32 to vector<1x8x128xf32>
    %c0_9 = arith.constant 0 : index
    %c0_10 = arith.constant 0 : index
    %c0_11 = arith.constant 0 : index
    %31 = vector.load %arg3[%c0_9, %c0_10, %c0_11] : memref<1x8x128xf32, #tpu.memory_space<vmem>>, vector<1x8x128xf32>
    tpu.vector_store %arg3[%c0_9, %c0_10, %c0_11], %30 {strides = array<i32>} : memref<1x8x128xf32, #tpu.memory_space<vmem>>, vector<1x8x128xf32>,
    return
  }
  func.func @transform_0(%arg0: i32) -> (i32, i32) {
    %c0_i32 = arith.constant 0 : i32
    %c0_i32_0 = arith.constant 0 : i32
    return %arg0, %c0_i32 : i32, i32
  }
  func.func @transform_1(%arg0: i32) -> (i32, i32) {
    %c0_i32 = arith.constant 0 : i32
    %c0_i32_0 = arith.constant 0 : i32
    return %arg0, %c0_i32 : i32, i32
  }
  func.func @transform_2(%arg0: i32) -> (i32, i32, i32) {
    %c0_i32 = arith.constant 0 : i32
    %c0_i32_0 = arith.constant 0 : i32
    %c0_i32_1 = arith.constant 0 : i32
    return %arg0, %c0_i32, %c0_i32_0 : i32, i32, i32
  }
}

</mosaic_0001>

<bundles_post_ra>
// kernel: tpu_custom_call.1
= control target key start
LH: loop header
LB: loop body
LE: loop exit
PB: predicated region body
PF: predicated region fallthrough
CT: control target
= control target key end

     0   :  { %vm14_vm0 = vcmask 261120   ;;  %s131_s0 = inlined_call_operand.vmem [shape: f32[8,32], index: 0, kind: input, shape index: {}]   ;;  %s132_s1 = inlined_call_operand.vmem [shape: s32[8,1], index: 1, kind: input, shape index: {}]   ;;  %s133_s2 = inlined_call_operand.hbm [shape: f32[1,8,128], index: 2, kind: output, shape index: {}]  }
   0x1   :  { %v12_v0 = vld [vmem:[%s131_s0] sm:$0xff] }
   0x2   :  { %7 = vsyncpa [#allocation3], 0  ;;  %v15_v1 = vsel %vm14_vm0, %v12_v0, -inf  ;;  %v102_v2 = vmov 0   ;;  %v13_v3 = vld [vmem:[%s132_s1] sm:$0xff]  ;;  %v19_v7 = vlaneseq  ;;  %vm44_vm2 = vcmask 7168  }
   0x3   :  { %75 = vset.pattern.permute.xlu0 %v102_v2  ;;  %s103_s0 = smov [#allocation2]  }
   0x4   :  { %16 = vmax.xlane.f32.xlu0 %v15_v1  ;;  %v20_v8 = vand.u32 127, %v19_v7  ;;  %s63_s1 = sshll.u32 %s103_s0, 4  ;;  %s64_s1 = int_to_ptr.vmem [resolvable:$true] %s63_s1 }
   0x5   :  { %s80_s14 = scalar_lea.vmem %s64_s1, 128  ;;  %p85_p1 = scmp.lt.s32.totalorder %s64_s1, %s64_s1 }
   0x6   :  { %p81_p0 = scmp.ne.s32.totalorder %s64_s1, %s80_s14  ;;  %p86_p2 = scmp.lt.s32.totalorder %s80_s14, %s80_s14 }
   0x8   :  { %p87_p3 = por %p86_p2, %p85_p1 }
   0xa   :  { %p88_p4 = pnand %p87_p3, %p81_p0 }
  0x1a   :  { %22 = vperm.xlu0 %75, %v13_v3  }
  0x8d   :  { %v17_v4 = vpop.xlane.xlu0 %16 }
  0x8e   :  { %v18_v5 = vsub.f32 %v12_v0, %v17_v4 }
  0x90   :  { %v29_v6 = vmul.f32 1.442695, %v18_v5 }
  0x92   :  { %76 = vpow2.f32 %v29_v6 }
  0x95   :  { %v23_v9 = vpop.permute.xlu0 %22 }
  0x96   :  { %vm24_vm1 = vcmp.eq.s32.totalorder %v20_v8, %v23_v9 }
  0x97   :  { %v25_v12 = vsel %vm24_vm1, %v18_v5, 0.0 }
  0x98   :  { %v26_v13 = vsel %vm14_vm0, %v25_v12, 0.0 }
  0x9f   :  { %v77_v10 = vpop.eup %76 }
  0xa0   :  { %v31_v11 = vsel %vm14_vm0, %v77_v10, 0.0 }
  0xa1   :  { %32 = vadd.xlane.f32.xlu1 %v31_v11 }
  0xa5   :  { %27 = vadd.xlane.f32.xlu1 %v26_v13 }
 0x12a   :  { %v33_v14 = vpop.xlane.xlu1 %32 }
 0x12b   :  { %78 = vlog2.f32 %v33_v14 }
 0x12e   :  { %v28_v17 = vpop.xlane.xlu1 %27 }
 0x138   :  { %v79_v15 = vpop.eup %78 }
 0x139   :  { %v35_v16 = vmul.f32 0.6931472, %v79_v15 }
 0x13b   :  { %v36_v18 = vsub.f32 %v35_v16, %v28_v17 }
 0x13d   :  { %v45_v19 = vsel %vm44_vm2, %v36_v18, 0.0 }
 0x13e   :  { %46 = vadd.xlane.f32.xlu1 %v45_v19 }
 0x1c7   :  { %v47_v20 = vpop.xlane.xlu1 %46 }
 0x1c8   :  { %v48_v21 = vrot.slane %v47_v20, 4 }
 0x1ca   :  { %v49_v22 = vadd.f32 %v48_v21, %v47_v20 }
 0x1cc   :  { %v50_v23 = vrot.slane %v49_v22, 2 }
 0x1ce   :  { %v51_v24 = vadd.f32 %v50_v23, %v49_v22 }
 0x1d0   :  { %v52_v25 = vrot.slane %v51_v24, 1 }
 0x1d2   :  { %v53_v26 = vadd.f32 %v52_v25, %v51_v24 }
 0x1d4   :  { %71 = vpush %v53_v26 }
 0x205   :  { %s72_s13 = spop %71 }
 0x206   :  { %v55_v27 = vstv %s72_s13 }
 0x207   :  { %56 = vst [vmem:[#allocation2] sm:$0xff] %v55_v27 }
 0x208   :  { %91 = shalt.err (!%p88_p4)
}
 0x209   :  { %66 = dma.vmem_to_hbm [thread:$0]  %s64_s1, 128, %s133_s2, [#allocation3]  }
 0x20a   :  { %100 = dma.done.wait [#allocation3], 128  }
 0x20b   :  { %101 = vsyncadd [#allocation3], 4294967168 }
 0x20c   :  { %70 = vsyncpa [#allocation3], 1 }

</bundles_post_ra>
